<compile_context>
chip_gen: v5e
topology: v5e:2x2
jax: 0.10.0
libtpu: 0.0.40
codegen_flags: <defaults>
</compile_context>

<pallas_src>
import functools

import jax
import jax.numpy as jnp
from jax.experimental import pallas as pl
from jax.experimental.pallas import tpu as pltpu


def _round_up(n: int, m: int) -> int:
    return (n + m - 1) // m * m


def _make_mlp_kernel(n_layers: int, f_act: str):
    """Fused MLP on one (tile_n, d_x) slab: [Linear -> act] * (n_layers-1) -> Linear."""

    def kernel(*refs):
        x_ref, o_ref = refs[0], refs[-1]
        wb_refs = refs[1:-1]
        h = x_ref[...]
        for li in range(n_layers):          # short static loop, unrolled at trace time
            w_ref = wb_refs[2 * li]
            b_ref = wb_refs[2 * li + 1]
            # MXU matmul with f32 accumulation; bias add / activation in f32
            # (no bf16 VPU/EUP dependence -> safe on v5e as well).
            h = jnp.dot(h.astype(w_ref.dtype), w_ref[...],
                        preferred_element_type=jnp.float32)
            h = h + b_ref[...]
            if li < n_layers - 1:
                h = jnp.tanh(h) if f_act == "tanh" else jnp.maximum(h, 0.0)
        o_ref[...] = h.astype(o_ref.dtype)

    return kernel


def _choose_tiles(n_flat: int):
    """Large tiles to amortize per-step overhead; even tile count so both v7x TCs work."""
    max_tile = 4096
    if n_flat <= 2 * max_tile:
        n_tiles = 2
        tile_n = max(8, _round_up(-(-n_flat // n_tiles), 8))   # sublane-aligned
    else:
        tile_n = max_tile
        n_tiles = _round_up(-(-n_flat // tile_n), 2)
    return tile_n, n_tiles


@functools.partial(jax.jit, static_argnames=("f_act", "use_bf16"))
def mlp_forward(x, params, f_act="tanh", use_bf16=False):
    """x: (1, n_points, d_x). params: ((W0,b0),...,(Wk,bk)), W stored as (d_in, d_out)."""
    assert x.ndim == 3 and x.shape[0] == 1, "Only n_task == 1 is supported!"
    n_task, n_points, d_x = x.shape
    n_layers = len(params)
    d_y = params[-1][0].shape[1]

    compute_dtype = jnp.bfloat16 if use_bf16 else jnp.float32
    act_bytes = jnp.dtype(compute_dtype).itemsize

    # ---- tile the point dimension only; feature dims keep their TRUE widths.
    n_flat = n_task * n_points
    tile_n, n_tiles = _choose_tiles(n_flat)
    n_pad = tile_n * n_tiles

    x2d = x.reshape(n_flat, d_x).astype(compute_dtype)
    if n_pad != n_flat:                      # cheap row-only pad (few KB at most)
        x2d = jnp.pad(x2d, ((0, n_pad - n_flat), (0, 0)))

    # Weights as MXU-input dtype; biases kept f32 (added after the f32 accumulate).
    flat_args = []
    for w, b in params:
        flat_args.append(w.astype(compute_dtype))
        flat_args.append(b.reshape(1, -1).astype(jnp.float32))

    # Weights/biases: full-array blocks with a constant index_map -> loaded once,
    # VMEM-resident across every grid step.
    def resident(a):
        return pl.BlockSpec(a.shape, lambda i: (0, 0))

    in_specs = [pl.BlockSpec((tile_n, d_x), lambda i: (i, 0))]      # streamed x tiles
    in_specs += [resident(a) for a in flat_args]
    out_spec = pl.BlockSpec((tile_n, d_y), lambda i: (i, 0))        # streamed output

    # Explicit (tiny) VMEM budget: double-buffered x/out streams + resident params
    # + intermediate-activation headroom, with 2x slack.  Far inside the 32 MiB
    # default scoped limit (and v7x's 64 MiB physical VMEM).
    widths = [d_x] + [w.shape[1] for w, _ in params]
    vmem_bytes = (
        2 * tile_n * d_x * act_bytes                               # x double buffer
        + 2 * tile_n * d_y * 4                                     # out double buffer
        + sum(w.size * act_bytes + b.size * 4 for w, b in params)  # resident params
        + 4 * tile_n * max(widths) * 4                             # activations
    )
    vmem_bytes = int(min(max(2 * vmem_bytes, 2 << 20), 32 << 20))

    # Accurate cost hint for XLA's scheduler.
    n_tanh = sum(w.shape[1] for w, _ in params[:-1]) if f_act == "tanh" else 0
    cost = pl.CostEstimate(
        flops=2 * n_pad * sum(w.shape[0] * w.shape[1] for w, _ in params),
        transcendentals=n_pad * n_tanh,
        bytes_accessed=(n_pad * d_x * act_bytes + n_pad * d_y * 4
                        + sum(w.size * act_bytes + b.size * 4 for w, b in params)),
    )

    out_pad = pl.pallas_call(
        _make_mlp_kernel(n_layers, f_act),
        out_shape=jax.ShapeDtypeStruct((n_pad, d_y), jnp.float32),
        grid=(n_tiles,),
        in_specs=in_specs,
        out_specs=out_spec,
        compiler_params=pltpu.CompilerParams(
            dimension_semantics=("parallel",),   # even tile count -> both v7x TCs busy
            vmem_limit_bytes=vmem_bytes,
        ),
        cost_estimate=cost,
    )(x2d, *flat_args)

    out = out_pad if n_pad == n_flat else out_pad[:n_flat]
    return out.reshape(n_task, n_points, d_y)


def init_mlp_params(key, d_x, d_y, hidden_units):
    """Deterministic init mimicking torch.nn.Linear (U[-1/sqrt(fan_in), +1/sqrt(fan_in)])."""
    dims = [d_x] + list(hidden_units) + [d_y]
    params = []
    for i in range(len(dims) - 1):
        d_in, d_out = dims[i], dims[i + 1]
        key, kw, kb = jax.random.split(key, 3)
        bound = 1.0 / (d_in ** 0.5)
        # Stored as (d_in, d_out) == PyTorch weight.T
        w = jax.random.uniform(kw, (d_in, d_out), jnp.float32, -bound, bound)
        b = jax.random.uniform(kb, (d_out,), jnp.float32, -bound, bound)
        params.append((w, b))
    return tuple(params)


def _ref(x2d, params):
    h = x2d
    for i, (w, b) in enumerate(params):
        h = h @ w + b
        if i < len(params) - 1:
            h = jnp.tanh(h)
    return h


if __name__ == "__main__":
    # MultiLayerPerceptron(d_x=8, d_y=4, f_act='tanh', n_hidden=2, d_hidden=32)
    d_x, d_y = 8, 4
    hidden_units = [32, 32]

    key = jax.random.PRNGKey(0)
    key, kp = jax.random.split(key)
    params = init_mlp_params(kp, d_x, d_y, hidden_units)

    expected = None
    x = None
    # Small case (padded 2-tile grid) and a larger case (two 768-row tiles, no padding).
    for n_points in (16, 1536):
        key, kx = jax.random.split(key)
        x = jax.random.normal(kx, (1, n_points, d_x), dtype=jnp.float32)

        expected = _ref(x.reshape(n_points, d_x), params).reshape(1, n_points, d_y)

        out = mlp_forward(x, params)
        jax.block_until_ready(out)
        assert out.shape == (1, n_points, d_y)
        assert jnp.allclose(out, expected, atol=1e-5, rtol=1e-5), (
            f"f32 mismatch at n_points={n_points}: "
            f"max err {jnp.max(jnp.abs(out - expected))}"
        )

    # Optional bf16 MXU-input fast path (v6e/v7x; also valid on v5e's MXU).
    out_bf16 = mlp_forward(x, params, use_bf16=True)
    jax.block_until_ready(out_bf16)
    assert jnp.allclose(out_bf16, expected, atol=1e-1, rtol=1e-1), (
        f"bf16 mismatch: max err {jnp.max(jnp.abs(out_bf16 - expected))}"
    )

    print("KERNEL_OK")
</pallas_src>

<mosaic_0001>
module attributes {stable_mosaic.version = 11 : i64} {
  func.func @kernel(%arg0: i32, %arg1: memref<8x8xf32, #tpu.memory_space<vmem>>, %arg2: memref<8x32xf32, #tpu.memory_space<vmem>>, %arg3: memref<1x32xf32, #tpu.memory_space<vmem>>, %arg4: memref<32x32xf32, #tpu.memory_space<vmem>>, %arg5: memref<1x32xf32, #tpu.memory_space<vmem>>, %arg6: memref<32x4xf32, #tpu.memory_space<vmem>>, %arg7: memref<1x4xf32, #tpu.memory_space<vmem>>, %arg8: memref<8x4xf32, #tpu.memory_space<vmem>>) attributes {dimension_semantics = [#tpu.dimension_semantics<parallel>], iteration_bounds = array<i64: 2>, scalar_prefetch = 0 : i64, scratch_operands = 0 : i64, tpu.core_type = #tpu.core_type<tc>, window_params = [{transform_indices = @transform_0, window_bounds = array<i64: 8, 8>}, {pipeline_mode = #tpu.pipeline_mode<synchronous>, transform_indices = @transform_1, window_bounds = array<i64: 8, 32>}, {pipeline_mode = #tpu.pipeline_mode<synchronous>, transform_indices = @transform_2, window_bounds = array<i64: 1, 32>}, {pipeline_mode = #tpu.pipeline_mode<synchronous>, transform_indices = @transform_3, window_bounds = array<i64: 32, 32>}, {pipeline_mode = #tpu.pipeline_mode<synchronous>, transform_indices = @transform_4, window_bounds = array<i64: 1, 32>}, {pipeline_mode = #tpu.pipeline_mode<synchronous>, transform_indices = @transform_5, window_bounds = array<i64: 32, 4>}, {pipeline_mode = #tpu.pipeline_mode<synchronous>, transform_indices = @transform_6, window_bounds = array<i64: 1, 4>}, {transform_indices = @transform_7, window_bounds = array<i64: 8, 4>}]} {
    %c0 = arith.constant 0 : index
    %c0_0 = arith.constant 0 : index
    %0 = vector.load %arg1[%c0, %c0_0] : memref<8x8xf32, #tpu.memory_space<vmem>>, vector<8x8xf32>
    %c0_1 = arith.constant 0 : index
    %c0_2 = arith.constant 0 : index
    %1 = vector.load %arg2[%c0_1, %c0_2] : memref<8x32xf32, #tpu.memory_space<vmem>>, vector<8x32xf32>
    %cst = arith.constant dense<0.000000e+00> : vector<8x32xf32>
    %2 = tpu.matmul %0, %1, %cst {dimension_numbers = #tpu.dot_dimension_numbers<[1], [0], [0], [1], [0, 0, 1, 1], [], []>} : vector<8x8xf32>, vector<8x32xf32>, vector<8x32xf32> -> vector<8x32xf32>
    %c0_3 = arith.constant 0 : index
    %c0_4 = arith.constant 0 : index
    %3 = vector.load %arg3[%c0_3, %c0_4] : memref<1x32xf32, #tpu.memory_space<vmem>>, vector<1x32xf32>
    %4 = vector.broadcast %3 : vector<1x32xf32> to vector<8x32xf32>
    %5 = arith.addf %2, %4 : vector<8x32xf32>
    %6 = math.tanh %5 : vector<8x32xf32>
    %c0_5 = arith.constant 0 : index
    %c0_6 = arith.constant 0 : index
    %7 = vector.load %arg4[%c0_5, %c0_6] : memref<32x32xf32, #tpu.memory_space<vmem>>, vector<32x32xf32>
    %cst_7 = arith.constant dense<0.000000e+00> : vector<8x32xf32>
    %8 = tpu.matmul %6, %7, %cst_7 {dimension_numbers = #tpu.dot_dimension_numbers<[1], [0], [0], [1], [0, 0, 1, 1], [], []>} : vector<8x32xf32>, vector<32x32xf32>, vector<8x32xf32> -> vector<8x32xf32>
    %c0_8 = arith.constant 0 : index
    %c0_9 = arith.constant 0 : index
    %9 = vector.load %arg5[%c0_8, %c0_9] : memref<1x32xf32, #tpu.memory_space<vmem>>, vector<1x32xf32>
    %10 = vector.broadcast %9 : vector<1x32xf32> to vector<8x32xf32>
    %11 = arith.addf %8, %10 : vector<8x32xf32>
    %12 = math.tanh %11 : vector<8x32xf32>
    %c0_10 = arith.constant 0 : index
    %c0_11 = arith.constant 0 : index
    %13 = vector.load %arg6[%c0_10, %c0_11] : memref<32x4xf32, #tpu.memory_space<vmem>>, vector<32x4xf32>
    %cst_12 = arith.constant dense<0.000000e+00> : vector<8x4xf32>
    %14 = tpu.matmul %12, %13, %cst_12 {dimension_numbers = #tpu.dot_dimension_numbers<[1], [0], [0], [1], [0, 0, 1, 1], [], []>} : vector<8x32xf32>, vector<32x4xf32>, vector<8x4xf32> -> vector<8x4xf32>
    %c0_13 = arith.constant 0 : index
    %c0_14 = arith.constant 0 : index
    %15 = vector.load %arg7[%c0_13, %c0_14] : memref<1x4xf32, #tpu.memory_space<vmem>>, vector<1x4xf32>
    %16 = vector.broadcast %15 : vector<1x4xf32> to vector<8x4xf32>
    %17 = arith.addf %14, %16 : vector<8x4xf32>
    %c0_15 = arith.constant 0 : index
    %c0_16 = arith.constant 0 : index
    %18 = vector.load %arg8[%c0_15, %c0_16] : memref<8x4xf32, #tpu.memory_space<vmem>>, vector<8x4xf32>
    tpu.vector_store %arg8[%c0_15, %c0_16], %17 {strides = array<i32>} : memref<8x4xf32, #tpu.memory_space<vmem>>, vector<8x4xf32>,
    return
  }
  func.func @transform_0(%arg0: i32) -> (i32, i32) {
    %c0_i32 = arith.constant 0 : i32
    %c0_i32_0 = arith.constant 0 : i32
    return %arg0, %c0_i32 : i32, i32
  }
  func.func @transform_1(%arg0: i32) -> (i32, i32) {
    %c0_i32 = arith.constant 0 : i32
    %c0_i32_0 = arith.constant 0 : i32
    %c0_i32_1 = arith.constant 0 : i32
    return %c0_i32, %c0_i32_0 : i32, i32
  }
  func.func @transform_2(%arg0: i32) -> (i32, i32) {
    %c0_i32 = arith.constant 0 : i32
    %c0_i32_0 = arith.constant 0 : i32
    %c0_i32_1 = arith.constant 0 : i32
    return %c0_i32, %c0_i32_0 : i32, i32
  }
  func.func @transform_3(%arg0: i32) -> (i32, i32) {
    %c0_i32 = arith.constant 0 : i32
    %c0_i32_0 = arith.constant 0 : i32
    %c0_i32_1 = arith.constant 0 : i32
    return %c0_i32, %c0_i32_0 : i32, i32
  }
  func.func @transform_4(%arg0: i32) -> (i32, i32) {
    %c0_i32 = arith.constant 0 : i32
    %c0_i32_0 = arith.constant 0 : i32
    %c0_i32_1 = arith.constant 0 : i32
    return %c0_i32, %c0_i32_0 : i32, i32
  }
  func.func @transform_5(%arg0: i32) -> (i32, i32) {
    %c0_i32 = arith.constant 0 : i32
    %c0_i32_0 = arith.constant 0 : i32
    %c0_i32_1 = arith.constant 0 : i32
    return %c0_i32, %c0_i32_0 : i32, i32
  }
  func.func @transform_6(%arg0: i32) -> (i32, i32) {
    %c0_i32 = arith.constant 0 : i32
    %c0_i32_0 = arith.constant 0 : i32
    %c0_i32_1 = arith.constant 0 : i32
    return %c0_i32, %c0_i32_0 : i32, i32
  }
  func.func @transform_7(%arg0: i32) -> (i32, i32) {
    %c0_i32 = arith.constant 0 : i32
    %c0_i32_0 = arith.constant 0 : i32
    return %arg0, %c0_i32 : i32, i32
  }
}

</mosaic_0001>

<bundles_post_ra>
// kernel: mlp_forward.1
= control target key start
LH: loop header
LB: loop body
LE: loop exit
PB: predicated region body
PF: predicated region fallthrough
CT: control target
= control target key end

     0   :  { %s499_s24 = smov 0   ;;  %s561_s0 = inlined_call_operand.vmem [shape: f32[16,8], index: 0, kind: input, shape index: {}]   ;;  %s562_s1 = inlined_call_operand.vmem [shape: f32[8,32], index: 1, kind: input, shape index: {}]   ;;  %s563_s2 = inlined_call_operand.vmem [shape: f32[1,32], index: 2, kind: input, shape index: {}]   ;;  %s564_s3 = inlined_call_operand.vmem [shape: f32[32,32], index: 3, kind: input, shape index: {}]   ;;  %s565_s4 = inlined_call_operand.vmem [shape: f32[1,32], index: 4, kind: input, shape index: {}]   ;;  %s566_s5 = inlined_call_operand.vmem [shape: f32[32,4], index: 5, kind: input, shape index: {}]   ;;  %s567_s6 = inlined_call_operand.vmem [shape: f32[1,4], index: 6, kind: input, shape index: {}]   ;;  %s568_s7 = inlined_call_operand.vmem [shape: f32[16,4], index: 7, kind: output, shape index: {}]  }
   0x1 LB: > { %s424_s25 = sadd.s32 4294967295, %s457_s24   ;;  %p428_p0 = scmp.ge.s32.totalorder %s457_s24, 1  ;;  %s457_s24 = sphi %s499_s24, %s17_s24  }
   0x2   : > { %p236_p1 = scmp.lt.s32.totalorder %s457_s24, 3 }
   0x4   : > { %p237_p2 = pnand %p428_p0, %p236_p1 }
   0x5   : > { %p266_p3 = scmp.lt.s32.totalorder (!%p237_p2), %s424_s25, 1 }
   0x6   : > { %240 = sbr.rel (%p237_p2) target bundleno = 420 (0x1a4), region = 48 }
   0xb   : > { %v275_v0 = vld [vmem:[%s562_s1] sm:$0xff]  ;;  %s570_s25 = smov (!%p266_p3, %s424_s25), 1  ;;  %vm280_vm0 = vcmask 64512   ;;  %v308_v2 = vld [vmem:[%s564_s3 + $0x18] sm:$0xff]  ;;  %v307_v3 = vld [vmem:[%s564_s3 + $0x10] sm:$0xff]  ;;  %vm313_vm1 = vcmask 261120  }
   0xc   : > { %299 = vmatpush.msra.mxu0 %v275_v0  ;;  %s429_s28 = sshll.u32 %s570_s25, 3  ;;  %329 = vmatpush.msra.mxu1 %v308_v2  ;;  %v306_v4 = vld [vmem:[%s564_s3 + $0x8] sm:$0xff]  ;;  %v305_v5 = vld [vmem:[%s564_s3] sm:$0xff]  ;;  %v341_v10 = vld [vmem:[%s566_s5 + $0x18] sm:$0xff]  ;;  %vm369_vm2 = vcmask 31744  }
   0xd   : > { %s269_s8 = scalar_lea.vmem %s561_s0, %s429_s28  ;;  %v444_v6 = vld [vmem:[%s563_s2] ss:$0 sm:$0xff]  ;;  %361 = vmatpush.msra.mxu2 %v341_v10  ;;  %v340_v11 = vld [vmem:[%s566_s5 + $0x10] sm:$0xff]  ;;  %v339_v12 = vld [vmem:[%s566_s5 + $0x8] sm:$0xff]  ;;  %s273_s13 = scalar_lea.vmem %s568_s7, %s429_s28 }
   0xe   : > { %v274_v1 = vld [vmem:[%s269_s8] sm:$0xff]  ;;  %330 = vmatpush.msra.mxu1 %v307_v3 }
   0xf   : > { %431 = vmatmul.msk.f32.vlgmr.msra.gmra.mxu0 %vm280_vm0, %v274_v1  ;;  %362 = vmatpush.msra.mxu2 %v340_v11  ;;  %v338_v13 = vld [vmem:[%s566_s5] sm:$0xff] }
  0x10   : > { %331 = vmatpush.msra.mxu1 %v306_v4  ;;  %v445_v14 = vld [vmem:[%s565_s4] ss:$0 sm:$0xff] }
  0x11   : > { %363 = vmatpush.msra.mxu2 %v339_v12  ;;  %v446_v18 = vld [vmem:[%s567_s6] ss:$0 sm:$0xff] }
  0x12   : > { %332 = vmatpush.msra.mxu1 %v305_v5 }
  0x13   : > { %364 = vmatpush.msra.mxu2 %v338_v13 }
  0x8c   : > { %v301_v7 = vpop.f32.mrf.mxu0 }
  0x8d   : > { %v302_v8 = vadd.f32 %v444_v6, %v301_v7 }
  0x8f   : > { %447 = vtanh.f32 %v302_v8 }
  0x95   : > { %v448_v9 = vpop.eup %447 }
  0x96   : > { %432 = vmatmul.msk.f32.vlgmr.msra.gmra.mxu1 %vm313_vm1, %v448_v9 }
 0x113   : > { %v334_v15 = vpop.f32.mrf.mxu1 }
 0x114   : > { %v335_v16 = vadd.f32 %v445_v14, %v334_v15 }
 0x116   : > { %449 = vtanh.f32 %v335_v16 }
 0x11c   : > { %v450_v17 = vpop.eup %449 }
 0x11d   : > { %433 = vmatmul.msk.f32.vlgmr.msra.gmra.mxu2 %vm313_vm1, %v450_v17 }
 0x1a0   : > { %v366_v19 = vpop.f32.mrf.mxu2 }
 0x1a1   : > { %v367_v20 = vadd.f32 %v446_v18, %v366_v19 }
 0x1a3   : > { %370 = vst.msk [vmem:[%s273_s13] sm:$0xff] %vm369_vm2, %v367_v20 }
 0x1a4 PF: > { %s17_s24 = sadd.s32 1, %s457_s24  }
 0x1a5   : > { %p14_p4 = scmp.ge.s32.totalorder %s17_s24, 4  }
 0x1a7   :  { %16 = sbr.rel (!%p14_p4) target bundleno = 1 (0x1), region = 78 }

</bundles_post_ra>
